<compile_context>
chip_gen: v7x
topology: tpu7x:2x2x1
jax: 0.10.0
libtpu: 0.0.40
codegen_flags: <defaults>
</compile_context>

<pallas_src>
import functools

import jax
import jax.numpy as jnp
from jax import lax
from jax.experimental import pallas as pl
from jax.experimental.pallas import tpu as pltpu


def _cont_loss_kernel(q_ref, k_ref, xt_ref, clr_ref, clc_ref, out_ref, *, inv_t):
    """Per-row-tile ContLoss contribution (cont_cutoff=False, knn_aug=False)."""
    tq = q_ref.shape[0]
    two_n = xt_ref.shape[1]                  # 2N total columns ([q; k] halves)

    q = q_ref[...]                           # (tq, C) native dtype
    k = k_ref[...]                           # (tq, C)

    # One fused MXU pass: logits = q @ [q; k]^T / T   -> (tq, 2N), f32 accumulate.
    logits = jnp.dot(q, xt_ref[...], preferred_element_type=jnp.float32) * inv_t

    # Positive logit q_i . k_i / T computed exactly on the VPU (no column gather needed).
    pos = jnp.sum(q.astype(jnp.float32) * k.astype(jnp.float32),
                  axis=1, keepdims=True) * inv_t                       # (tq, 1)

    # Self column: global column (row0 + r) of the q half, for local row r of this tile.
    row0 = pl.program_id(0) * tq
    cols = lax.broadcasted_iota(jnp.int32, (tq, two_n), 1)
    rows = lax.broadcasted_iota(jnp.int32, (tq, two_n), 0)
    is_self = cols == rows + row0                                      # (tq, 2N) bool

    # Numerically-stable fused LSE over both halves; self column contributes exactly 0.
    row_max = jnp.max(logits, axis=1, keepdims=True)                   # (tq, 1)
    lg = logits - row_max                                              # (tq, 2N), <= 0
    e = jnp.where(is_self, 0.0, jnp.exp(lg))
    denom = jnp.sum(e, axis=1, keepdims=True)                          # (tq, 1), self excluded

    # InfoNCE per row:  -( l_pos - log( sum_{j != i} exp(l_ij) ) )   (stable form).
    nce = -(pos - row_max - jnp.log(denom))                            # (tq, 1)

    # Supervised-contrastive (cluster) per row.
    # sum(mask * log_prob) = sum(mask * lg) - cnt * log(denom + eps), so no (tq, 2N)
    # log-prob array is ever materialized.
    mm = jnp.logical_and(clr_ref[...] == clc_ref[...],
                         jnp.logical_not(is_self))                     # (tq, 2N) bool
    s_masked = jnp.sum(jnp.where(mm, lg, 0.0), axis=1, keepdims=True)  # (tq, 1)
    cnt = jnp.sum(mm.astype(jnp.float32), axis=1, keepdims=True)       # (tq, 1), >= 1 always
    prot = -(s_masked / cnt - jnp.log(denom + 1e-12))                  # (tq, 1)

    out_ref[...] = (nce + prot).astype(out_ref.dtype)


def cont_loss_pallas(q, k, cluster_idxes, temperature=0.07, block_rows=128):
    """Pallas implementation of ContLoss.forward(q, k, cluster_idxes)."""
    n, c = q.shape
    tq = n if n < block_rows else block_rows
    if n % tq != 0:
        raise ValueError(f"batch size {n} must be a multiple of the row tile {tq}")
    two_n = 2 * n

    # Single pre-transposed RHS (C, 2N): canonical MXU layout, one resident block.
    x_t = jnp.concatenate([q, k], axis=0).T                       # (C, 2N)
    cl = cluster_idxes.astype(jnp.int32)
    cl_rows = cl.reshape(n, 1)
    cl_cols = jnp.concatenate([cl, cl], axis=0).reshape(1, two_n)

    kernel = functools.partial(_cont_loss_kernel, inv_t=float(1.0 / temperature))

    # VMEM budget: resident (C,2N) RHS (+ default double buffering), double-buffered (tq,C)
    # tiles, and ~10 live (tq,2N) f32/bool intermediates. Clamp to 64 MiB (legal everywhere).
    need = (2 * 4 * (c * two_n + two_n)          # resident RHS + cluster columns, x2 buffers
            + 2 * 2 * 4 * tq * c                 # q/k tiles, double-buffered
            + 10 * 4 * tq * two_n                # live intermediates
            + (2 << 20))                         # slack
    vmem_limit = int(min(max(need, 32 * 1024 * 1024), 64 * 1024 * 1024))

    per_row = pl.pallas_call(
        kernel,
        out_shape=jax.ShapeDtypeStruct((n, 1), jnp.float32),
        grid=(n // tq,),
        in_specs=[
            pl.BlockSpec((tq, c), lambda i: (i, 0)),      # q rows (tiled)
            pl.BlockSpec((tq, c), lambda i: (i, 0)),      # k rows (tiled)
            pl.BlockSpec((c, two_n), lambda i: (0, 0)),   # [q;k]^T (resident across steps)
            pl.BlockSpec((tq, 1), lambda i: (i, 0)),      # cluster ids (row tile)
            pl.BlockSpec((1, two_n), lambda i: (0, 0)),   # cluster ids (all 2N columns)
        ],
        out_specs=pl.BlockSpec((tq, 1), lambda i: (i, 0)),
        compiler_params=pltpu.CompilerParams(
            dimension_semantics=("parallel",),
            vmem_limit_bytes=vmem_limit,
        ),
        cost_estimate=pl.CostEstimate(
            flops=2 * n * two_n * c + 12 * n * two_n,
            transcendentals=n * two_n + 3 * n,
            bytes_accessed=4 * (2 * n * c + c * two_n + two_n + n + n),
        ),
    )(q, k, x_t, cl_rows, cl_cols)

    return jnp.mean(per_row)


def cont_loss_reference(q, k, cluster_idxes, temperature=0.07):
    """Pure-JAX reference, mathematically identical to the PyTorch forward
    (cont_cutoff / knn_aug off) but written in numerically-stable form."""
    n = q.shape[0]
    q_and_k = jnp.concatenate([q, k], axis=0)
    logits = jnp.dot(q, q_and_k.T, precision=lax.Precision.HIGHEST) / temperature
    col = jnp.arange(2 * n)[None, :]
    row = jnp.arange(n)[:, None]
    not_self = col != row
    pos_mask = col == row + n

    lmax = jnp.max(logits, axis=1, keepdims=True)
    lg = logits - lmax
    exps = jnp.where(not_self, jnp.exp(lg), 0.0)
    denom = jnp.sum(exps, axis=1, keepdims=True)
    l_pos = jnp.sum(jnp.where(pos_mask, logits, 0.0), axis=1, keepdims=True)
    loss = -jnp.mean(l_pos - lmax - jnp.log(denom))

    cl = cluster_idxes.reshape(-1, 1)
    mask = (cl == jnp.concatenate([cl, cl], axis=0).T) & not_self
    log_prob = lg - jnp.log(denom + 1e-12)
    mean_log_prob_pos = jnp.where(mask, log_prob, 0.0).sum(1) / mask.sum(1)
    loss += -jnp.mean(mean_log_prob_pos)
    return loss


if __name__ == "__main__":
    N, C = 16, 32
    key = jax.random.PRNGKey(0)
    kq, kk, kc = jax.random.split(key, 3)
    q = jax.random.normal(kq, (N, C), dtype=jnp.float32)
    k = jax.random.normal(kk, (N, C), dtype=jnp.float32)
    # Contrastive embeddings are L2-normalized in practice (MoCo/SupCon usage of this loss).
    q = q / jnp.linalg.norm(q, axis=1, keepdims=True)
    k = k / jnp.linalg.norm(k, axis=1, keepdims=True)
    cluster_idxes = jax.random.randint(kc, (N,), 0, 4)

    loss = cont_loss_pallas(q, k, cluster_idxes, temperature=0.07)
    loss = jax.block_until_ready(loss)

    ref = cont_loss_reference(q, k, cluster_idxes, temperature=0.07)
    assert jnp.isfinite(loss), loss
    # Kernel uses default MXU matmul precision (per perf review); tolerance sized for the
    # ~bf16-level logit rounding amplified by 1/T against the HIGHEST-precision reference.
    assert jnp.allclose(loss, ref, rtol=1e-2, atol=1e-2), (loss, ref)
    print("KERNEL_OK")
</pallas_src>

<mosaic_0001>
module attributes {stable_mosaic.version = 11 : i64} {
  func.func @_cont_loss_kernel(%arg0: i32, %arg1: memref<16x32xf32, #tpu.memory_space<vmem>>, %arg2: memref<16x32xf32, #tpu.memory_space<vmem>>, %arg3: memref<32x32xf32, #tpu.memory_space<vmem>>, %arg4: memref<16x1xi32, #tpu.memory_space<vmem>>, %arg5: memref<1x32xi32, #tpu.memory_space<vmem>>, %arg6: memref<16x1xf32, #tpu.memory_space<vmem>>) attributes {dimension_semantics = [#tpu.dimension_semantics<parallel>], iteration_bounds = array<i64: 1>, scalar_prefetch = 0 : i64, scratch_operands = 0 : i64, tpu.core_type = #tpu.core_type<tc>, window_params = [{transform_indices = @transform_0, window_bounds = array<i64: 16, 32>}, {transform_indices = @transform_1, window_bounds = array<i64: 16, 32>}, {pipeline_mode = #tpu.pipeline_mode<synchronous>, transform_indices = @transform_2, window_bounds = array<i64: 32, 32>}, {transform_indices = @transform_3, window_bounds = array<i64: 16, 1>}, {pipeline_mode = #tpu.pipeline_mode<synchronous>, transform_indices = @transform_4, window_bounds = array<i64: 1, 32>}, {transform_indices = @transform_5, window_bounds = array<i64: 16, 1>}]} {
    %c0 = arith.constant 0 : index
    %c0_0 = arith.constant 0 : index
    %0 = vector.load %arg1[%c0, %c0_0] : memref<16x32xf32, #tpu.memory_space<vmem>>, vector<16x32xf32>
    %c0_1 = arith.constant 0 : index
    %c0_2 = arith.constant 0 : index
    %1 = vector.load %arg2[%c0_1, %c0_2] : memref<16x32xf32, #tpu.memory_space<vmem>>, vector<16x32xf32>
    %c0_3 = arith.constant 0 : index
    %c0_4 = arith.constant 0 : index
    %2 = vector.load %arg3[%c0_3, %c0_4] : memref<32x32xf32, #tpu.memory_space<vmem>>, vector<32x32xf32>
    %cst = arith.constant dense<0.000000e+00> : vector<16x32xf32>
    %3 = tpu.matmul %0, %2, %cst {dimension_numbers = #tpu.dot_dimension_numbers<[1], [0], [0], [1], [0, 0, 1, 1], [], []>} : vector<16x32xf32>, vector<32x32xf32>, vector<16x32xf32> -> vector<16x32xf32>
    %cst_5 = arith.constant 14.2857141 : f32
    %4 = vector.broadcast %cst_5 : f32 to vector<16x32xf32>
    %5 = arith.mulf %3, %4 : vector<16x32xf32>
    %6 = arith.mulf %0, %1 : vector<16x32xf32>
    %cst_6 = arith.constant dense<0.000000e+00> : vector<16xf32>
    %7 = vector.multi_reduction <add>, %6, %cst_6 [1] : vector<16x32xf32> to vector<16xf32>
    %8 = vector.shape_cast %7 : vector<16xf32> to vector<16x1xf32>
    %cst_7 = arith.constant 14.2857141 : f32
    %9 = vector.broadcast %cst_7 : f32 to vector<16x1xf32>
    %10 = arith.mulf %8, %9 : vector<16x1xf32>
    %c16_i32 = arith.constant 16 : i32
    %11 = arith.muli %arg0, %c16_i32 : i32
    %12 = tpu.iota {dimensions = array<i32: 1>} : vector<16x32xi32>
    %13 = tpu.iota {dimensions = array<i32: 0>} : vector<16x32xi32>
    %14 = vector.broadcast %11 : i32 to vector<16x32xi32>
    %15 = arith.addi %13, %14 : vector<16x32xi32>
    %16 = arith.cmpi eq, %12, %15 : vector<16x32xi32>
    %cst_8 = arith.constant dense<0xFF800000> : vector<16xf32>
    %17 = vector.multi_reduction <maximumf>, %5, %cst_8 [1] : vector<16x32xf32> to vector<16xf32>
    %18 = vector.shape_cast %17 : vector<16xf32> to vector<16x1xf32>
    %19 = vector.broadcast %18 : vector<16x1xf32> to vector<16x32xf32>
    %20 = arith.subf %5, %19 : vector<16x32xf32>
    %21 = math.exp %20 : vector<16x32xf32>
    %cst_9 = arith.constant 0.000000e+00 : f32
    %22 = vector.broadcast %cst_9 : f32 to vector<16x32xf32>
    %23 = arith.select %16, %22, %21 : vector<16x32xi1>, vector<16x32xf32>
    %cst_10 = arith.constant dense<0.000000e+00> : vector<16xf32>
    %24 = vector.multi_reduction <add>, %23, %cst_10 [1] : vector<16x32xf32> to vector<16xf32>
    %25 = vector.shape_cast %24 : vector<16xf32> to vector<16x1xf32>
    %26 = arith.subf %10, %18 : vector<16x1xf32>
    %27 = math.log %25 : vector<16x1xf32>
    %28 = arith.subf %26, %27 : vector<16x1xf32>
    %cst_11 = arith.constant 0.000000e+00 : f32
    %29 = vector.broadcast %cst_11 : f32 to vector<16x1xf32>
    %30 = arith.subf %29, %28 : vector<16x1xf32>
    %c0_12 = arith.constant 0 : index
    %c0_13 = arith.constant 0 : index
    %31 = vector.load %arg4[%c0_12, %c0_13] : memref<16x1xi32, #tpu.memory_space<vmem>>, vector<16x1xi32>
    %c0_14 = arith.constant 0 : index
    %c0_15 = arith.constant 0 : index
    %32 = vector.load %arg5[%c0_14, %c0_15] : memref<1x32xi32, #tpu.memory_space<vmem>>, vector<1x32xi32>
    %33 = vector.broadcast %31 : vector<16x1xi32> to vector<16x32xi32>
    %34 = vector.broadcast %32 : vector<1x32xi32> to vector<16x32xi32>
    %35 = arith.cmpi eq, %33, %34 : vector<16x32xi32>
    %cst_16 = arith.constant dense<true> : vector<16x32xi1>
    %36 = arith.xori %16, %cst_16 : vector<16x32xi1>
    %37 = arith.andi %35, %36 : vector<16x32xi1>
    %cst_17 = arith.constant 0.000000e+00 : f32
    %38 = vector.broadcast %cst_17 : f32 to vector<16x32xf32>
    %39 = arith.select %37, %20, %38 : vector<16x32xi1>, vector<16x32xf32>
    %cst_18 = arith.constant dense<0.000000e+00> : vector<16xf32>
    %40 = vector.multi_reduction <add>, %39, %cst_18 [1] : vector<16x32xf32> to vector<16xf32>
    %41 = vector.shape_cast %40 : vector<16xf32> to vector<16x1xf32>
    %42 = arith.extui %37 : vector<16x32xi1> to vector<16x32xi32>
    %43 = arith.sitofp %42 : vector<16x32xi32> to vector<16x32xf32>
    %cst_19 = arith.constant dense<0.000000e+00> : vector<16xf32>
    %44 = vector.multi_reduction <add>, %43, %cst_19 [1] : vector<16x32xf32> to vector<16xf32>
    %45 = vector.shape_cast %44 : vector<16xf32> to vector<16x1xf32>
    %46 = arith.divf %41, %45 : vector<16x1xf32>
    %cst_20 = arith.constant 9.99999996E-13 : f32
    %47 = vector.broadcast %cst_20 : f32 to vector<16x1xf32>
    %48 = arith.addf %25, %47 : vector<16x1xf32>
    %49 = math.log %48 : vector<16x1xf32>
    %50 = arith.subf %46, %49 : vector<16x1xf32>
    %cst_21 = arith.constant 0.000000e+00 : f32
    %51 = vector.broadcast %cst_21 : f32 to vector<16x1xf32>
    %52 = arith.subf %51, %50 : vector<16x1xf32>
    %53 = arith.addf %30, %52 : vector<16x1xf32>
    %c0_22 = arith.constant 0 : index
    %c0_23 = arith.constant 0 : index
    %54 = vector.load %arg6[%c0_22, %c0_23] : memref<16x1xf32, #tpu.memory_space<vmem>>, vector<16x1xf32>
    tpu.vector_store %arg6[%c0_22, %c0_23], %53 {strides = array<i32>} : memref<16x1xf32, #tpu.memory_space<vmem>>, vector<16x1xf32>,
    return
  }
  func.func @transform_0(%arg0: i32) -> (i32, i32) {
    %c0_i32 = arith.constant 0 : i32
    %c0_i32_0 = arith.constant 0 : i32
    return %arg0, %c0_i32 : i32, i32
  }
  func.func @transform_1(%arg0: i32) -> (i32, i32) {
    %c0_i32 = arith.constant 0 : i32
    %c0_i32_0 = arith.constant 0 : i32
    return %arg0, %c0_i32 : i32, i32
  }
  func.func @transform_2(%arg0: i32) -> (i32, i32) {
    %c0_i32 = arith.constant 0 : i32
    %c0_i32_0 = arith.constant 0 : i32
    %c0_i32_1 = arith.constant 0 : i32
    return %c0_i32, %c0_i32_0 : i32, i32
  }
  func.func @transform_3(%arg0: i32) -> (i32, i32) {
    %c0_i32 = arith.constant 0 : i32
    %c0_i32_0 = arith.constant 0 : i32
    return %arg0, %c0_i32 : i32, i32
  }
  func.func @transform_4(%arg0: i32) -> (i32, i32) {
    %c0_i32 = arith.constant 0 : i32
    %c0_i32_0 = arith.constant 0 : i32
    %c0_i32_1 = arith.constant 0 : i32
    return %c0_i32, %c0_i32_0 : i32, i32
  }
  func.func @transform_5(%arg0: i32) -> (i32, i32) {
    %c0_i32 = arith.constant 0 : i32
    %c0_i32_0 = arith.constant 0 : i32
    return %arg0, %c0_i32 : i32, i32
  }
}

</mosaic_0001>

<bundles_post_ra>
// kernel: tpu_custom_call.1
= control target key start
LH: loop header
LB: loop body
LE: loop exit
PB: predicated region body
PF: predicated region fallthrough
CT: control target
= control target key end

     0   :  { %10 = vsyncpa [#allocation3], 0  ;;  %s474_s0 = inlined_call_operand.vmem [shape: f32[16,32], index: 0, kind: input, shape index: {}]   ;;  %s475_s1 = inlined_call_operand.hbm [shape: f32[16,32], index: 1, kind: input, shape index: {}]   ;;  %s476_s2 = inlined_call_operand.hbm [shape: f32[32,32], index: 2, kind: input, shape index: {}]   ;;  %s477_s3 = inlined_call_operand.vmem [shape: s32[16,1], index: 3, kind: input, shape index: {}]   ;;  %s478_s4 = inlined_call_operand.vmem [shape: s32[1,32], index: 4, kind: input, shape index: {}]   ;;  %s479_s5 = inlined_call_operand.vmem [shape: f32[16,1], index: 5, kind: output, shape index: {}]  }
   0x1   :  { %11 = vsyncpa [#allocation5], 0  ;;  %s356_s18 = smov [#allocation2]   ;;  %s308_s22 = scalar_lea.hbm %s475_s1, 256 }
   0x2   :  { %s19_s19 = sshll.u32 %s356_s18, 4  ;;  %p309_p0 = scmp.ne.s32.totalorder %s475_s1, %s308_s22  ;;  %s20_s19 = int_to_ptr.vmem [resolvable:$true] %s19_s19 }
   0x3   :  { %p312_p1 = scmp.lt.u32.totalorder %s308_s22, %s475_s1 }
   0x5   :  { %p314_p2 = pnand %p312_p1, %p309_p0 }
   0x7   :  { %317 = shalt.err (!%p314_p2)
}
   0x8   :  { %s318_s27 = scalar_lea.vmem %s20_s19, 256  ;;  %p323_p4 = scmp.lt.s32.totalorder %s20_s19, %s20_s19 }
   0x9   :  { %p319_p3 = scmp.ne.s32.totalorder %s20_s19, %s318_s27  ;;  %p324_p5 = scmp.lt.s32.totalorder %s318_s27, %s318_s27 }
   0xb   :  { %p325_p6 = por %p324_p5, %p323_p4 }
   0xd   :  { %p326_p7 = pnand %p325_p6, %p319_p3 }
   0xf   :  { %329 = shalt.err (!%p326_p7)
}
  0x10   :  { %s357_s28 = smov 128   ;;  %s358_s29 = smov 8  }
  0x11   :  { %25 = dma.hbm_to_vmem [thread:$0]  %s475_s1, 256, %s20_s19, [#allocation3], %s357_s28, %s357_s28, %s358_s29  }
  0x12   :  { %s359_s7 = smov [#allocation4]   ;;  %s330_s11 = scalar_lea.hbm %s476_s2, 512 }
  0x13   :  { %s31_s8 = sshll.u32 %s359_s7, 4  ;;  %p331_p8 = scmp.ne.s32.totalorder %s476_s2, %s330_s11  ;;  %s32_s8 = int_to_ptr.vmem [resolvable:$true] %s31_s8 }
  0x14   :  { %p334_p9 = scmp.lt.u32.totalorder %s330_s11, %s476_s2 }
  0x16   :  { %p336_p10 = pnand %p334_p9, %p331_p8 }
  0x18   :  { %339 = shalt.err (!%p336_p10)
}
  0x19   :  { %s340_s16 = scalar_lea.vmem %s32_s8, 512  ;;  %p345_p12 = scmp.lt.s32.totalorder %s32_s8, %s32_s8 }
  0x1a   :  { %p341_p11 = scmp.ne.s32.totalorder %s32_s8, %s340_s16  ;;  %p346_p13 = scmp.lt.s32.totalorder %s340_s16, %s340_s16 }
  0x1c   :  { %p347_p0 = por %p346_p13, %p345_p12 }
  0x1e   :  { %p348_p1 = pnand %p347_p0, %p341_p11 }
  0x20   :  { %351 = shalt.err (!%p348_p1)
}
  0x21   :  { %37 = dma.hbm_to_vmem [thread:$0]  %s476_s2, 512, %s32_s8, [#allocation5], %s357_s28, %s357_s28, %s358_s29  }
  0x22   :  { %352 = dma.done.wait [#allocation3], 256  }
  0x23   :  { %353 = vsyncadd [#allocation3], 4294967040 }
  0x24   :  { %354 = dma.done.wait [#allocation5], 512  }
  0x25   :  { %355 = vsyncadd [#allocation5], 4294966784  ;;  %vm56_vm0 = vcmask 261120   ;;  %v52_v0 = vld [vmem:[#allocation4] sm:$0xff]  ;;  %v53_v1 = vld [vmem:[#allocation4 + $0x8] sm:$0xff]  ;;  %v360_v9 = vmov 0   ;;  %v151_v17 = vlaneseq }
  0x26   :  { %v54_v2 = vld [vmem:[#allocation4 + $0x10] sm:$0xff]  ;;  %v275_v3 = vpack.c.bf16 %v53_v1, %v52_v0  ;;  %v55_v4 = vld [vmem:[#allocation4 + $0x18] sm:$0xff]  ;;  %290 = vset.pattern.permute.xlu1 %v360_v9  ;;  %291 = vset.pattern.permute.xlu0 %v360_v9  ;;  %vm361_vm2 = vmmov 1   ;;  %v362_v25 = vmov 0.0   ;;  %vm244_vm10 = vcmask 7168  }
  0x27   :  { %v48_v5 = vld [vmem:[%s474_s0] sm:$0xff]  ;;  %v279_v6 = vpack.c.bf16 %v55_v4, %v54_v2  ;;  %v49_v7 = vld [vmem:[%s474_s0 + $0x8] sm:$0xff]  ;;  %v152_v18 = vand.u32 127, %v151_v17  ;;  %v154_v19 = vshrl.u32 %v151_v17, 7 }
  0x28   :  { %272 = vmatprep.mubr.msk.f32.mxu0 %vm56_vm0, %v48_v5  ;;  %276 = vmatprep.subr.bf16.mxu0 %v275_v3  ;;  %v191_v8 = vld [vmem:[%s477_s3] sm:$0xff]  ;;  %v192_v10 = vld [vmem:[%s477_s3 + $0x8] sm:$0xff] }
  0x29   :  { %278 = vmatpush3.bf16.msra.mxu0 %v275_v3  ;;  %195 = vperm.xlu1 %290, %v191_v8   ;;  %vm159_vm1 = vcmp.eq.s32.totalorder %v152_v18, %v154_v19  ;;  %v255_v20 = vld [vmem:[%s478_s4] ss:$0 sm:$0xff]  ;;  %v155_v22 = vadd.s32 8, %v154_v19  ;;  %v51_v41 = vld [vmem:[#allocation2 + $0x8] sm:$0xff] }
  0x2a   :  { %280 = vmatprep.subr.bf16.mxu0 %v279_v6  ;;  %vm206_vm3 = vmxor %vm159_vm1, %vm361_vm2  ;;  %v50_v37 = vld [vmem:[#allocation2] sm:$0xff]  ;;  %v141_v45 = vmul.f32 %v51_v41, %v49_v7 }
  0x2b   :  { %vm160_vm6 = vcmp.eq.s32.totalorder %v152_v18, %v155_v22  ;;  %v140_v39 = vmul.f32 %v50_v37, %v48_v5 }
  0x2c   :  { %vm207_vm7 = vmxor %vm160_vm6, %vm361_vm2  ;;  %v145_v48 = vsel %vm56_vm0, %v141_v45, 0.0 }
  0x2d   :  { %282 = vmatpush3.bf16.msra.mxu0 %v279_v6  ;;  %198 = vperm.xlu1 %290, %v192_v10   ;;  %v142_v44 = vsel %vm56_vm0, %v140_v39, 0.0 }
  0x30   :  { %273 = vmatmul.mubr.msk.f32.vlgmr.msra.gmra.mrb[0].mxu0 %vm56_vm0, %v49_v7 }
  0xa8   :  { %v196_v21 = vpop.permute.xlu1 %195 }
  0xa9   :  { %vm204_vm4 = vcmp.eq.s32.totalorder %v196_v21, %v255_v20 }
  0xaa   :  { %vm437_vm5 = vmand %vm204_vm4, %vm206_vm3 }
  0xab   :  { %v256_v26 = vsel %vm437_vm5, 1.0, %v362_v25 }
  0xac   :  { %v199_v24 = vpop.permute.xlu1 %198  ;;  %v222_v27 = vsel %vm56_vm0, %v256_v26, 0.0 }
  0xad   :  { %vm205_vm8 = vcmp.eq.s32.totalorder %v199_v24, %v255_v20 }
  0xae   :  { %vm445_vm9 = vmand %vm205_vm8, %vm207_vm7 }
  0xaf   :  { %v257_v29 = vsel %vm445_vm9, 1.0, %v362_v25 }
  0xb0   :  { %v225_v30 = vsel %vm56_vm0, %v257_v29, 0.0 }
 0x103   :  { %v274_v11 = vpop.f32.mrb[0].mxu0 }
 0x104   :  { %v129_v12 = vpop.f32.mrb[1].mxu0  ;;  %v139_v14 = vmul.f32 14.285714, %v274_v11 }
 0x105   :  { %v138_v13 = vmul.f32 14.285714, %v129_v12 }
 0x106   :  { %v164_v16 = vsel %vm56_vm0, %v139_v14, -inf }
 0x107   :  { %v161_v15 = vsel %vm56_vm0, %v138_v13, -inf }
 0x108   :  { %162 = vmax.xlane.f32.xlu0 %v161_v15 }
 0x10c   :  { %165 = vmax.xlane.f32.xlu0 %v164_v16 }
 0x110   :  { %223 = vadd.xlane.f32.xlu0 %v222_v27 }
 0x114   :  { %226 = vadd.xlane.f32.xlu0 %v225_v30 }
 0x195   :  { %v163_v31 = vpop.xlane.xlu0 %162 }
 0x196   :  { %v167_v32 = vsub.f32 %v138_v13, %v163_v31 }
 0x198   :  { %v169_v33 = vmul.f32 1.442695, %v167_v32  ;;  %v210_v49 = vsel %vm437_vm5, %v167_v32, 0.0 }
 0x199   :  { %v452_v34 = vpop.xlane.xlu0 %165  ;;  %v212_v50 = vsel %vm56_vm0, %v210_v49, 0.0 }
 0x19a   :  { %292 = vpow2.f32 %v169_v33  ;;  %v168_v35 = vsub.f32 %v139_v14, %v452_v34 }
 0x19c   :  { %v171_v36 = vmul.f32 1.442695, %v168_v35  ;;  %v211_v51 = vsel %vm445_vm9, %v168_v35, 0.0 }
 0x19d   :  { %v215_v52 = vsel %vm56_vm0, %v211_v51, 0.0  ;;  %v224_v53 = vpop.xlane.xlu0 %223 }
 0x19e   :  { %294 = vpow2.f32 %v171_v36 }
 0x1a1   :  { %v227_v54 = vpop.xlane.xlu0 %226 }
 0x1a4   :  { %v293_v38 = vpop.eup %292 }
 0x1a5   :  { %v173_v40 = vsel %vm159_vm1, 0.0, %v293_v38 }
 0x1a6   :  { %v175_v42 = vsel %vm56_vm0, %v173_v40, 0.0 }
 0x1a7   :  { %176 = vadd.xlane.f32.xlu0 %v175_v42 }
 0x1a8   :  { %v295_v43 = vpop.eup %294 }
 0x1a9   :  { %v174_v46 = vsel %vm160_vm6, 0.0, %v295_v43 }
 0x1aa   :  { %v178_v47 = vsel %vm56_vm0, %v174_v46, 0.0 }
 0x1ab   :  { %143 = vadd.xlane.f32.xlu0 %v142_v44  ;;  %179 = vadd.xlane.f32.xlu1 %v178_v47 }
 0x1af   :  { %146 = vadd.xlane.f32.xlu0 %v145_v48 }
 0x1b3   :  { %213 = vadd.xlane.f32.xlu0 %v212_v50 }
 0x1b7   :  { %216 = vadd.xlane.f32.xlu0 %v215_v52 }
 0x234   :  { %v177_v55 = vpop.xlane.xlu0 %176 }
 0x235   :  { %296 = vlog2.f32 %v177_v55  ;;  %v232_v56 = vadd.f32 1e-12, %v177_v55 }
 0x236   :  { %298 = vrcp.f32 %v224_v53 }
 0x237   :  { %300 = vlog2.f32 %v232_v56 }
 0x238   :  { %v180_v57 = vpop.xlane.xlu1 %179  ;;  %v144_v58 = vpop.xlane.xlu0 %143 }
 0x239   :  { %302 = vlog2.f32 %v180_v57  ;;  %v233_v59 = vadd.f32 1e-12, %v180_v57  ;;  %v148_v60 = vmul.f32 14.285714, %v144_v58 }
 0x23a   :  { %304 = vrcp.f32 %v227_v54 }
 0x23b   :  { %306 = vlog2.f32 %v233_v59  ;;  %v181_v1 = vsub.f32 %v148_v60, %v163_v31 }
 0x23c   :  { %v147_v61 = vpop.xlane.xlu0 %146 }
 0x23d   :  { %v149_v2 = vmul.f32 14.285714, %v147_v61 }
 0x23f   :  { %v297_v62 = vpop.eup %296  ;;  %v182_v11 = vsub.f32 %v149_v2, %v452_v34 }
 0x240   :  { %v299_v63 = vpop.eup %298  ;;  %v184_v0 = vmul.f32 0.6931472, %v297_v62  ;;  %v214_v3 = vpop.xlane.xlu0 %213 }
 0x241   :  { %v301_v4 = vpop.eup %300  ;;  %v229_v5 = vmul.f32 %v299_v63, %v214_v3 }
 0x242   :  { %v187_v6 = vsub.f32 %v181_v1, %v184_v0  ;;  %v235_v7 = vmul.f32 0.6931472, %v301_v4 }
 0x243   :  { %v303_v8 = vpop.eup %302 }
 0x244   :  { %v305_v9 = vpop.eup %304  ;;  %v186_v10 = vmul.f32 0.6931472, %v303_v8  ;;  %v238_v12 = vsub.f32 %v229_v5, %v235_v7  ;;  %v217_v13 = vpop.xlane.xlu0 %216  ;;  %v189_v17 = vsub.f32 0.0, %v187_v6 }
 0x245   :  { %v307_v14 = vpop.eup %306  ;;  %v231_v15 = vmul.f32 %v305_v9, %v217_v13 }
 0x246   :  { %v237_v16 = vmul.f32 0.6931472, %v307_v14  ;;  %v188_v18 = vsub.f32 %v182_v11, %v186_v10  ;;  %v240_v19 = vsub.f32 0.0, %v238_v12 }
 0x248   :  { %v242_v20 = vadd.f32 %v240_v19, %v189_v17  ;;  %v239_v21 = vsub.f32 %v231_v15, %v237_v16  ;;  %v190_v22 = vsub.f32 0.0, %v188_v18 }
 0x24a   :  { %245 = vst.msk [vmem:[%s479_s5] sm:$0xff] %vm244_vm10, %v242_v20  ;;  %v241_v23 = vsub.f32 0.0, %v239_v21 }
 0x24c   :  { %v243_v24 = vadd.f32 %v241_v23, %v190_v22 }
 0x24e   :  { %246 = vst.msk [vmem:[%s479_s5 + $0x8] sm:$0xff] %vm244_vm10, %v243_v24 }
 0x24f   :  { %251 = vsyncpa [#allocation3], 1 }
 0x250   :  { %252 = vsyncpa [#allocation5], 1 }

</bundles_post_ra>
